<compile_context>
chip_gen: v5e
topology: v5e:2x2
jax: 0.10.0
libtpu: 0.0.40
codegen_flags: <defaults>
</compile_context>

<pallas_src>
import jax
import jax.numpy as jnp
from jax.experimental import pallas as pl
from jax.experimental.pallas import tpu as pltpu

LANE = 128
TAIL_ROWS = 32                      # int8 min-tile rows; tail block = (32, 128)
TAIL_ELEMS = TAIL_ROWS * LANE       # 4096
MAX_TILE_ROWS = 1024                # (1024, 128) f32 tile = 512 KiB per buffer


def _make_kernel(n, rows_main, tile_r, tail_pad):
    n_f = float(n)
    tail_corr = 0.5 * float(tail_pad)   # padded tail logits are 0 -> sigmoid = 0.5

    def fold(x):
        # (r, 128) -> (8, 128): sum 8-row slabs; leading-axis sum stays on the VPU.
        return x.reshape(x.shape[0] // 8, 8, LANE).sum(axis=0)

    def kernel(main_o_ref, main_s_ref, tail_o_ref, tail_s_ref, loss_ref,
               acc_pt_ref, acc_p1_ref, acc_c1_ref):
        i = pl.program_id(0)
        last = pl.num_programs(0) - 1

        def accumulate(p, s):
            acc_pt_ref[...] += fold(p)          # sum sigmoid (all)
            acc_p1_ref[...] += fold(p * s)      # sum sigmoid (group 1)
            acc_c1_ref[...] += fold(s)          # count group 1

        @pl.when(i == 0)
        def _():
            # Initialize accumulators directly with the (zero-padded) tail block.
            tp = jax.nn.sigmoid(tail_o_ref[...].astype(jnp.float32))
            ts = tail_s_ref[...].astype(jnp.float32)
            acc_pt_ref[...] = fold(tp)
            acc_p1_ref[...] = fold(tp * ts)
            acc_c1_ref[...] = fold(ts)

        p = jax.nn.sigmoid(main_o_ref[...].astype(jnp.float32))
        s = main_s_ref[...].astype(jnp.float32)      # exact {0,1} indicator

        @pl.when(i < last)
        def _():
            accumulate(p, s)                         # steady state: no mask math

        @pl.when(i == last)
        def _():
            # Only the last main block may overhang rows_main (undefined VMEM data),
            # so the row mask lives exclusively on this step.
            row = jax.lax.broadcasted_iota(jnp.int32, (tile_r, LANE), 0)
            valid = (i * tile_r + row) < rows_main
            accumulate(jnp.where(valid, p, 0.0), jnp.where(valid, s, 0.0))

            sum_t = jnp.sum(acc_pt_ref[...]) - tail_corr
            sum_1 = jnp.sum(acc_p1_ref[...])
            cnt_1 = jnp.sum(acc_c1_ref[...])
            sum_0 = sum_t - sum_1
            cnt_0 = n_f - cnt_1
            mean1 = sum_1 / jnp.maximum(cnt_1, 1.0)
            mean0 = sum_0 / jnp.maximum(cnt_0, 1.0)
            # torch semantics: no positives -> mean1 := mean0; all positives -> mean0 := mean1.
            mean1 = jnp.where(cnt_1 == 0.0, mean0, mean1)
            mean0 = jnp.where(cnt_0 == 0.0, mean1, mean0)
            d = mean1 - mean0
            loss_ref[0, 0] = d * d

    return kernel


def demographic_parity_loss_squared(X, out, sensitive, y=None):
    """Matches DemographicParityLoss_squared.forward. X and y are unused."""
    del X, y
    out_f = out.reshape(-1)                                    # native dtype logits
    sens_ind = (sensitive.reshape(-1) == 1).astype(jnp.int8)   # {0,1}, 1 B/elem stream
    n = out_f.shape[0]

    # Split off a small tail so the large prefix is a free reshape (no full-array pad).
    n_main = (n // TAIL_ELEMS) * TAIL_ELEMS
    n_tail = n - n_main
    rows_main = n_main // LANE                                 # multiple of TAIL_ROWS

    tail_pad = TAIL_ELEMS - n_tail                             # <= 4095 zero elements
    tail_out = jnp.pad(out_f[n_main:], (0, tail_pad)).reshape(TAIL_ROWS, LANE)
    tail_sens = jnp.pad(sens_ind[n_main:], (0, tail_pad)).reshape(TAIL_ROWS, LANE)

    if rows_main > 0:
        main_out = out_f[:n_main].reshape(rows_main, LANE)
        main_sens = sens_ind[:n_main].reshape(rows_main, LANE)
        tile_r = min(MAX_TILE_ROWS, rows_main)
        grid_steps = pl.cdiv(rows_main, tile_r)
    else:
        # Everything fits in the tail: feed a tiny dummy main block, fully masked out.
        main_out = jnp.zeros((TAIL_ROWS, LANE), out_f.dtype)
        main_sens = jnp.zeros((TAIL_ROWS, LANE), jnp.int8)
        tile_r = TAIL_ROWS
        grid_steps = 1

    kernel = _make_kernel(n, rows_main, tile_r, tail_pad)

    loss = pl.pallas_call(
        kernel,
        out_shape=jax.ShapeDtypeStruct((1, 1), jnp.float32),
        grid_spec=pltpu.PrefetchScalarGridSpec(
            num_scalar_prefetch=0,
            grid=(grid_steps,),
            in_specs=[
                pl.BlockSpec((tile_r, LANE), lambda i: (i, 0)),      # main logits
                pl.BlockSpec((tile_r, LANE), lambda i: (i, 0)),      # main sensitive (int8)
                pl.BlockSpec((TAIL_ROWS, LANE), lambda i: (0, 0)),   # tail logits (resident)
                pl.BlockSpec((TAIL_ROWS, LANE), lambda i: (0, 0)),   # tail sensitive (resident)
            ],
            out_specs=pl.BlockSpec(memory_space=pltpu.MemorySpace.SMEM),
            scratch_shapes=[
                pltpu.VMEM((8, LANE), jnp.float32),  # sum sigmoid (all)
                pltpu.VMEM((8, LANE), jnp.float32),  # sum sigmoid (group 1)
                pltpu.VMEM((8, LANE), jnp.float32),  # count group 1
            ],
        ),
        compiler_params=pltpu.CompilerParams(
            dimension_semantics=("arbitrary",),
        ),
    )(main_out, main_sens, tail_out, tail_sens)
    return loss[0, 0]


def _reference_loss(out, sensitive):
    p = jax.nn.sigmoid(out.astype(jnp.float32).reshape(-1))
    m1 = sensitive.reshape(-1) == 1
    cnt1 = jnp.sum(m1.astype(jnp.float32))
    cnt0 = jnp.float32(p.shape[0]) - cnt1
    sum1 = jnp.sum(jnp.where(m1, p, 0.0))
    sum0 = jnp.sum(p) - sum1
    mean1 = sum1 / jnp.maximum(cnt1, 1.0)
    mean0 = sum0 / jnp.maximum(cnt0, 1.0)
    mean1 = jnp.where(cnt1 == 0.0, mean0, mean1)
    mean0 = jnp.where(cnt0 == 0.0, mean1, mean0)
    return (mean1 - mean0) ** 2


if __name__ == "__main__":
    key = jax.random.PRNGKey(0)

    def run_case(case_key, batch, p_sensitive):
        k_out, k_sens = jax.random.split(case_key)
        X = jnp.zeros((batch, 4), dtype=jnp.float32)   # accepted but unused by forward
        out = jax.random.normal(k_out, (batch,), dtype=jnp.float32)
        if p_sensitive is None:
            sensitive = jnp.zeros((batch,), dtype=jnp.float32)   # no group-1 members
        else:
            sensitive = jax.random.bernoulli(k_sens, p_sensitive, (batch,)).astype(jnp.float32)
        loss = jax.block_until_ready(demographic_parity_loss_squared(X, out, sensitive))
        ref = _reference_loss(out, sensitive)
        assert jnp.allclose(loss, ref, atol=1e-6, rtol=1e-3), (batch, loss, ref)

    keys = jax.random.split(key, 4)
    run_case(keys[0], 1000, 0.4)      # tail-only path (n < 4096)
    run_case(keys[1], 4417, 0.3)      # main prefix + tail, single grid step
    run_case(keys[2], 300, None)      # cnt_1 == 0 edge case (torch special-case branch)
    run_case(keys[3], 200000, 0.5)    # multi-step grid + masked overhang on last block

    print("KERNEL_OK")
</pallas_src>

<mosaic_0001>
module attributes {stable_mosaic.version = 11 : i64} {
  func.func @kernel(%arg0: i32, %arg1: memref<32x128xf32, #tpu.memory_space<vmem>>, %arg2: memref<32x128xi8, #tpu.memory_space<vmem>>, %arg3: memref<32x128xf32, #tpu.memory_space<vmem>>, %arg4: memref<32x128xi8, #tpu.memory_space<vmem>>, %arg5: memref<1x1xf32, #tpu.memory_space<smem>>, %arg6: memref<8x128xf32, #tpu.memory_space<vmem>>, %arg7: memref<8x128xf32, #tpu.memory_space<vmem>>, %arg8: memref<8x128xf32, #tpu.memory_space<vmem>>) attributes {dimension_semantics = [#tpu.dimension_semantics<arbitrary>], iteration_bounds = array<i64: 1>, scalar_prefetch = 0 : i64, scratch_operands = 3 : i64, tpu.core_type = #tpu.core_type<tc>, window_params = [{transform_indices = @transform_0, window_bounds = array<i64: 32, 128>}, {transform_indices = @transform_1, window_bounds = array<i64: 32, 128>}, {pipeline_mode = #tpu.pipeline_mode<synchronous>, transform_indices = @transform_2, window_bounds = array<i64: 32, 128>}, {pipeline_mode = #tpu.pipeline_mode<synchronous>, transform_indices = @transform_3, window_bounds = array<i64: 32, 128>}, {transform_indices = @transform_4, window_bounds = array<i64: 1, 1>}]} {
    %c0_i32 = arith.constant 0 : i32
    %0 = arith.cmpi eq, %arg0, %c0_i32 : i32
    %1 = arith.extui %0 : i1 to i32
    %c0_i32_0 = arith.constant 0 : i32
    %2 = arith.cmpi ne, %1, %c0_i32_0 : i32
    scf.if %2 {
      %c0_8 = arith.constant 0 : index
      %c0_9 = arith.constant 0 : index
      %17 = vector.load %arg3[%c0_8, %c0_9] : memref<32x128xf32, #tpu.memory_space<vmem>>, vector<32x128xf32>
      %18 = arith.negf %17 : vector<32x128xf32>
      %19 = math.exp %18 : vector<32x128xf32>
      %cst_10 = arith.constant 1.000000e+00 : f32
      %20 = vector.broadcast %cst_10 : f32 to vector<32x128xf32>
      %21 = arith.addf %20, %19 : vector<32x128xf32>
      %22 = arith.divf %20, %21 : vector<32x128xf32>
      %c0_11 = arith.constant 0 : index
      %c0_12 = arith.constant 0 : index
      %23 = vector.load %arg4[%c0_11, %c0_12] : memref<32x128xi8, #tpu.memory_space<vmem>>, vector<32x128xi8>
      %24 = arith.sitofp %23 : vector<32x128xi8> to vector<32x128xf32>
      %25 = vector.shape_cast %22 : vector<32x128xf32> to vector<4x8x128xf32>
      %cst_13 = arith.constant dense<0.000000e+00> : vector<8x128xf32>
      %26 = vector.multi_reduction <add>, %25, %cst_13 [0] : vector<4x8x128xf32> to vector<8x128xf32>
      %c0_14 = arith.constant 0 : index
      %c0_15 = arith.constant 0 : index
      %27 = vector.load %arg6[%c0_14, %c0_15] : memref<8x128xf32, #tpu.memory_space<vmem>>, vector<8x128xf32>
      tpu.vector_store %arg6[%c0_14, %c0_15], %26 {strides = array<i32>} : memref<8x128xf32, #tpu.memory_space<vmem>>, vector<8x128xf32>,
      %28 = arith.mulf %22, %24 : vector<32x128xf32>
      %29 = vector.shape_cast %28 : vector<32x128xf32> to vector<4x8x128xf32>
      %cst_16 = arith.constant dense<0.000000e+00> : vector<8x128xf32>
      %30 = vector.multi_reduction <add>, %29, %cst_16 [0] : vector<4x8x128xf32> to vector<8x128xf32>
      %c0_17 = arith.constant 0 : index
      %c0_18 = arith.constant 0 : index
      %31 = vector.load %arg7[%c0_17, %c0_18] : memref<8x128xf32, #tpu.memory_space<vmem>>, vector<8x128xf32>
      tpu.vector_store %arg7[%c0_17, %c0_18], %30 {strides = array<i32>} : memref<8x128xf32, #tpu.memory_space<vmem>>, vector<8x128xf32>,
      %32 = vector.shape_cast %24 : vector<32x128xf32> to vector<4x8x128xf32>
      %cst_19 = arith.constant dense<0.000000e+00> : vector<8x128xf32>
      %33 = vector.multi_reduction <add>, %32, %cst_19 [0] : vector<4x8x128xf32> to vector<8x128xf32>
      %c0_20 = arith.constant 0 : index
      %c0_21 = arith.constant 0 : index
      %34 = vector.load %arg8[%c0_20, %c0_21] : memref<8x128xf32, #tpu.memory_space<vmem>>, vector<8x128xf32>
      tpu.vector_store %arg8[%c0_20, %c0_21], %33 {strides = array<i32>} : memref<8x128xf32, #tpu.memory_space<vmem>>, vector<8x128xf32>,
    } else {
    }
    %c0 = arith.constant 0 : index
    %c0_1 = arith.constant 0 : index
    %3 = vector.load %arg1[%c0, %c0_1] : memref<32x128xf32, #tpu.memory_space<vmem>>, vector<32x128xf32>
    %4 = arith.negf %3 : vector<32x128xf32>
    %5 = math.exp %4 : vector<32x128xf32>
    %cst = arith.constant 1.000000e+00 : f32
    %6 = vector.broadcast %cst : f32 to vector<32x128xf32>
    %7 = arith.addf %6, %5 : vector<32x128xf32>
    %8 = arith.divf %6, %7 : vector<32x128xf32>
    %c0_2 = arith.constant 0 : index
    %c0_3 = arith.constant 0 : index
    %9 = vector.load %arg2[%c0_2, %c0_3] : memref<32x128xi8, #tpu.memory_space<vmem>>, vector<32x128xi8>
    %10 = arith.sitofp %9 : vector<32x128xi8> to vector<32x128xf32>
    %c0_i32_4 = arith.constant 0 : i32
    %11 = arith.cmpi slt, %arg0, %c0_i32_4 : i32
    %12 = arith.extui %11 : i1 to i32
    %c0_i32_5 = arith.constant 0 : i32
    %13 = arith.cmpi ne, %12, %c0_i32_5 : i32
    scf.if %13 {
      %c0_8 = arith.constant 0 : index
      %c0_9 = arith.constant 0 : index
      %17 = vector.load %arg6[%c0_8, %c0_9] : memref<8x128xf32, #tpu.memory_space<vmem>>, vector<8x128xf32>
      %18 = vector.shape_cast %8 : vector<32x128xf32> to vector<4x8x128xf32>
      %cst_10 = arith.constant dense<0.000000e+00> : vector<8x128xf32>
      %19 = vector.multi_reduction <add>, %18, %cst_10 [0] : vector<4x8x128xf32> to vector<8x128xf32>
      %20 = arith.addf %17, %19 : vector<8x128xf32>
      %c0_11 = arith.constant 0 : index
      %c0_12 = arith.constant 0 : index
      %21 = vector.load %arg6[%c0_11, %c0_12] : memref<8x128xf32, #tpu.memory_space<vmem>>, vector<8x128xf32>
      tpu.vector_store %arg6[%c0_11, %c0_12], %20 {strides = array<i32>} : memref<8x128xf32, #tpu.memory_space<vmem>>, vector<8x128xf32>,
      %c0_13 = arith.constant 0 : index
      %c0_14 = arith.constant 0 : index
      %22 = vector.load %arg7[%c0_13, %c0_14] : memref<8x128xf32, #tpu.memory_space<vmem>>, vector<8x128xf32>
      %23 = arith.mulf %8, %10 : vector<32x128xf32>
      %24 = vector.shape_cast %23 : vector<32x128xf32> to vector<4x8x128xf32>
      %cst_15 = arith.constant dense<0.000000e+00> : vector<8x128xf32>
      %25 = vector.multi_reduction <add>, %24, %cst_15 [0] : vector<4x8x128xf32> to vector<8x128xf32>
      %26 = arith.addf %22, %25 : vector<8x128xf32>
      %c0_16 = arith.constant 0 : index
      %c0_17 = arith.constant 0 : index
      %27 = vector.load %arg7[%c0_16, %c0_17] : memref<8x128xf32, #tpu.memory_space<vmem>>, vector<8x128xf32>
      tpu.vector_store %arg7[%c0_16, %c0_17], %26 {strides = array<i32>} : memref<8x128xf32, #tpu.memory_space<vmem>>, vector<8x128xf32>,
      %c0_18 = arith.constant 0 : index
      %c0_19 = arith.constant 0 : index
      %28 = vector.load %arg8[%c0_18, %c0_19] : memref<8x128xf32, #tpu.memory_space<vmem>>, vector<8x128xf32>
      %29 = vector.shape_cast %10 : vector<32x128xf32> to vector<4x8x128xf32>
      %cst_20 = arith.constant dense<0.000000e+00> : vector<8x128xf32>
      %30 = vector.multi_reduction <add>, %29, %cst_20 [0] : vector<4x8x128xf32> to vector<8x128xf32>
      %31 = arith.addf %28, %30 : vector<8x128xf32>
      %c0_21 = arith.constant 0 : index
      %c0_22 = arith.constant 0 : index
      %32 = vector.load %arg8[%c0_21, %c0_22] : memref<8x128xf32, #tpu.memory_space<vmem>>, vector<8x128xf32>
      tpu.vector_store %arg8[%c0_21, %c0_22], %31 {strides = array<i32>} : memref<8x128xf32, #tpu.memory_space<vmem>>, vector<8x128xf32>,
    } else {
    }
    %c0_i32_6 = arith.constant 0 : i32
    %14 = arith.cmpi eq, %arg0, %c0_i32_6 : i32
    %15 = arith.extui %14 : i1 to i32
    %c0_i32_7 = arith.constant 0 : i32
    %16 = arith.cmpi ne, %15, %c0_i32_7 : i32
    scf.if %16 {
      %17 = tpu.iota {dimensions = array<i32: 0>} : vector<32x128xi32>
      %c32_i32 = arith.constant 32 : i32
      %18 = arith.muli %arg0, %c32_i32 : i32
      %19 = vector.broadcast %18 : i32 to vector<32x128xi32>
      %20 = arith.addi %19, %17 : vector<32x128xi32>
      %c0_i32_8 = arith.constant 0 : i32
      %21 = vector.broadcast %c0_i32_8 : i32 to vector<32x128xi32>
      %22 = arith.cmpi slt, %20, %21 : vector<32x128xi32>
      %cst_9 = arith.constant 0.000000e+00 : f32
      %23 = vector.broadcast %cst_9 : f32 to vector<32x128xf32>
      %24 = arith.select %22, %8, %23 : vector<32x128xi1>, vector<32x128xf32>
      %cst_10 = arith.constant 0.000000e+00 : f32
      %25 = vector.broadcast %cst_10 : f32 to vector<32x128xf32>
      %26 = arith.select %22, %10, %25 : vector<32x128xi1>, vector<32x128xf32>
      %c0_11 = arith.constant 0 : index
      %c0_12 = arith.constant 0 : index
      %27 = vector.load %arg6[%c0_11, %c0_12] : memref<8x128xf32, #tpu.memory_space<vmem>>, vector<8x128xf32>
      %28 = vector.shape_cast %24 : vector<32x128xf32> to vector<4x8x128xf32>
      %cst_13 = arith.constant dense<0.000000e+00> : vector<8x128xf32>
      %29 = vector.multi_reduction <add>, %28, %cst_13 [0] : vector<4x8x128xf32> to vector<8x128xf32>
      %30 = arith.addf %27, %29 : vector<8x128xf32>
      %c0_14 = arith.constant 0 : index
      %c0_15 = arith.constant 0 : index
      %31 = vector.load %arg6[%c0_14, %c0_15] : memref<8x128xf32, #tpu.memory_space<vmem>>, vector<8x128xf32>
      tpu.vector_store %arg6[%c0_14, %c0_15], %30 {strides = array<i32>} : memref<8x128xf32, #tpu.memory_space<vmem>>, vector<8x128xf32>,
      %c0_16 = arith.constant 0 : index
      %c0_17 = arith.constant 0 : index
      %32 = vector.load %arg7[%c0_16, %c0_17] : memref<8x128xf32, #tpu.memory_space<vmem>>, vector<8x128xf32>
      %33 = arith.mulf %24, %26 : vector<32x128xf32>
      %34 = vector.shape_cast %33 : vector<32x128xf32> to vector<4x8x128xf32>
      %cst_18 = arith.constant dense<0.000000e+00> : vector<8x128xf32>
      %35 = vector.multi_reduction <add>, %34, %cst_18 [0] : vector<4x8x128xf32> to vector<8x128xf32>
      %36 = arith.addf %32, %35 : vector<8x128xf32>
      %c0_19 = arith.constant 0 : index
      %c0_20 = arith.constant 0 : index
      %37 = vector.load %arg7[%c0_19, %c0_20] : memref<8x128xf32, #tpu.memory_space<vmem>>, vector<8x128xf32>
      tpu.vector_store %arg7[%c0_19, %c0_20], %36 {strides = array<i32>} : memref<8x128xf32, #tpu.memory_space<vmem>>, vector<8x128xf32>,
      %c0_21 = arith.constant 0 : index
      %c0_22 = arith.constant 0 : index
      %38 = vector.load %arg8[%c0_21, %c0_22] : memref<8x128xf32, #tpu.memory_space<vmem>>, vector<8x128xf32>
      %39 = vector.shape_cast %26 : vector<32x128xf32> to vector<4x8x128xf32>
      %cst_23 = arith.constant dense<0.000000e+00> : vector<8x128xf32>
      %40 = vector.multi_reduction <add>, %39, %cst_23 [0] : vector<4x8x128xf32> to vector<8x128xf32>
      %41 = arith.addf %38, %40 : vector<8x128xf32>
      %c0_24 = arith.constant 0 : index
      %c0_25 = arith.constant 0 : index
      %42 = vector.load %arg8[%c0_24, %c0_25] : memref<8x128xf32, #tpu.memory_space<vmem>>, vector<8x128xf32>
      tpu.vector_store %arg8[%c0_24, %c0_25], %41 {strides = array<i32>} : memref<8x128xf32, #tpu.memory_space<vmem>>, vector<8x128xf32>,
      %c0_26 = arith.constant 0 : index
      %c0_27 = arith.constant 0 : index
      %43 = vector.load %arg6[%c0_26, %c0_27] : memref<8x128xf32, #tpu.memory_space<vmem>>, vector<8x128xf32>
      %44 = vector.shape_cast %43 : vector<8x128xf32> to vector<1x8x128xf32>
      %cst_28 = arith.constant dense<0.000000e+00> : vector<1xf32>
      %45 = vector.multi_reduction <add>, %44, %cst_28 [1, 2] : vector<1x8x128xf32> to vector<1xf32>
      %46 = vector.shape_cast %45 : vector<1xf32> to vector<1x1x1xf32>
      %47 = vector.extract %46[0, 0, 0] : f32 from vector<1x1x1xf32>
      %cst_29 = arith.constant 1.548000e+03 : f32
      %48 = arith.subf %47, %cst_29 : f32
      %c0_30 = arith.constant 0 : index
      %c0_31 = arith.constant 0 : index
      %49 = vector.load %arg7[%c0_30, %c0_31] : memref<8x128xf32, #tpu.memory_space<vmem>>, vector<8x128xf32>
      %50 = vector.shape_cast %49 : vector<8x128xf32> to vector<1x8x128xf32>
      %cst_32 = arith.constant dense<0.000000e+00> : vector<1xf32>
      %51 = vector.multi_reduction <add>, %50, %cst_32 [1, 2] : vector<1x8x128xf32> to vector<1xf32>
      %52 = vector.shape_cast %51 : vector<1xf32> to vector<1x1x1xf32>
      %53 = vector.extract %52[0, 0, 0] : f32 from vector<1x1x1xf32>
      %c0_33 = arith.constant 0 : index
      %c0_34 = arith.constant 0 : index
      %54 = vector.load %arg8[%c0_33, %c0_34] : memref<8x128xf32, #tpu.memory_space<vmem>>, vector<8x128xf32>
      %55 = vector.shape_cast %54 : vector<8x128xf32> to vector<1x8x128xf32>
      %cst_35 = arith.constant dense<0.000000e+00> : vector<1xf32>
      %56 = vector.multi_reduction <add>, %55, %cst_35 [1, 2] : vector<1x8x128xf32> to vector<1xf32>
      %57 = vector.shape_cast %56 : vector<1xf32> to vector<1x1x1xf32>
      %58 = vector.extract %57[0, 0, 0] : f32 from vector<1x1x1xf32>
      %59 = arith.subf %48, %53 : f32
      %cst_36 = arith.constant 1.000000e+03 : f32
      %60 = arith.subf %cst_36, %58 : f32
      %cst_37 = arith.constant 1.000000e+00 : f32
      %61 = arith.maximumf %58, %cst_37 : f32
      %62 = arith.divf %53, %61 : f32
      %cst_38 = arith.constant 1.000000e+00 : f32
      %63 = arith.maximumf %60, %cst_38 : f32
      %64 = arith.divf %59, %63 : f32
      %cst_39 = arith.constant 0.000000e+00 : f32
      %65 = arith.cmpf oeq, %58, %cst_39 : f32
      %66 = arith.select %65, %64, %62 : f32
      %cst_40 = arith.constant 0.000000e+00 : f32
      %67 = arith.cmpf oeq, %60, %cst_40 : f32
      %68 = arith.select %67, %66, %64 : f32
      %69 = arith.subf %66, %68 : f32
      %70 = arith.mulf %69, %69 : f32
      %c0_41 = arith.constant 0 : index
      %c0_42 = arith.constant 0 : index
      %71 = memref.load %arg5[%c0_41, %c0_42] : memref<1x1xf32, #tpu.memory_space<smem>>
      memref.store %70, %arg5[%c0_41, %c0_42] : memref<1x1xf32, #tpu.memory_space<smem>>
    } else {
    }
    return
  }
  func.func @transform_0(%arg0: i32) -> (i32, i32) {
    %c0_i32 = arith.constant 0 : i32
    %c0_i32_0 = arith.constant 0 : i32
    return %arg0, %c0_i32 : i32, i32
  }
  func.func @transform_1(%arg0: i32) -> (i32, i32) {
    %c0_i32 = arith.constant 0 : i32
    %c0_i32_0 = arith.constant 0 : i32
    return %arg0, %c0_i32 : i32, i32
  }
  func.func @transform_2(%arg0: i32) -> (i32, i32) {
    %c0_i32 = arith.constant 0 : i32
    %c0_i32_0 = arith.constant 0 : i32
    %c0_i32_1 = arith.constant 0 : i32
    return %c0_i32, %c0_i32_0 : i32, i32
  }
  func.func @transform_3(%arg0: i32) -> (i32, i32) {
    %c0_i32 = arith.constant 0 : i32
    %c0_i32_0 = arith.constant 0 : i32
    %c0_i32_1 = arith.constant 0 : i32
    return %c0_i32, %c0_i32_0 : i32, i32
  }
  func.func @transform_4(%arg0: i32) -> (i32, i32) {
    %c0_i32 = arith.constant 0 : i32
    %c0_i32_0 = arith.constant 0 : i32
    %c0_i32_1 = arith.constant 0 : i32
    return %c0_i32, %c0_i32_0 : i32, i32
  }
}

</mosaic_0001>

<bundles_post_ra>
// kernel: tpu_custom_call.1
= control target key start
LH: loop header
LB: loop body
LE: loop exit
PB: predicated region body
PF: predicated region fallthrough
CT: control target
= control target key end

     0   :  { %9 = vsyncpa [#allocation6], 0  ;;  %s715_s0 = inlined_call_operand.hbm [shape: f32[32,128], index: 0, kind: input, shape index: {}]   ;;  %s716_s1 = inlined_call_operand.hbm [shape: s8[32,128], index: 1, kind: input, shape index: {}]   ;;  %s717_s2 = inlined_call_operand.hbm [shape: f32[32,128], index: 2, kind: input, shape index: {}]   ;;  %s718_s3 = inlined_call_operand.hbm [shape: s8[32,128], index: 3, kind: input, shape index: {}]   ;;  %s719_s4 = inlined_call_operand.hbm [shape: f32[1,1], index: 4, kind: output, shape index: {}]  }
   0x1   :  { %10 = vsyncpa [#allocation9], 0 }
   0x2   :  { %11 = vsyncpa [#allocation12], 0  ;;  %s31_s17 = sshll.u32 %s716_s1, 4  ;;  %s32_s17 = int_to_ptr.hbm [resolvable:$true] %s31_s17 }
   0x3   :  { %12 = vsyncpa [#allocation7], 0  ;;  %s607_s18 = smov [#allocation8]   ;;  %s17_s22 = sshll.u32 %s715_s0, 4  ;;  %s18_s22 = int_to_ptr.hbm [resolvable:$true] %s17_s22 }
   0x4   :  { %s33_s19 = sshll.u32 %s607_s18, 4  ;;  %s608_s23 = smov [#allocation5]   ;;  %s34_s19 = int_to_ptr.vmem [resolvable:$true] %s33_s19 }
   0x5   :  { %36 = dma.hbm_to_vmem [thread:$0]  %s32_s17, 128, %s34_s19, [#allocation9]  }
   0x6   :  { %s19_s24 = sshll.u32 %s608_s23, 4  ;;  %s609_s25 = smov 128   ;;  %s20_s24 = int_to_ptr.vmem [resolvable:$true] %s19_s24 }
   0x7   :  { %s610_s26 = smov 8   ;;  %s41_s1 = sshll.u32 %s717_s2, 4  ;;  %s42_s1 = int_to_ptr.hbm [resolvable:$true] %s41_s1 }
   0x8   :  { %25 = dma.hbm_to_vmem [thread:$0]  %s18_s22, 512, %s20_s24, [#allocation6], %s609_s25, %s609_s25, %s610_s26  }
   0x9   :  { %s611_s29 = smov [#allocation10]   ;;  %s55_s0 = sshll.u32 %s718_s3, 4  ;;  %s56_s0 = int_to_ptr.hbm [resolvable:$true] %s55_s0 }
   0xa   :  { %s43_s30 = sshll.u32 %s611_s29, 4  ;;  %s612_s7 = smov [#allocation11]   ;;  %s44_s30 = int_to_ptr.vmem [resolvable:$true] %s43_s30 }
   0xb   :  { %49 = dma.hbm_to_vmem [thread:$0]  %s42_s1, 512, %s44_s30, [#allocation9], %s609_s25, %s609_s25, %s610_s26  }
   0xc   :  { %s57_s8 = sshll.u32 %s612_s7, 4  ;;  %s58_s8 = int_to_ptr.vmem [resolvable:$true] %s57_s8 }
   0xd   :  { %60 = dma.hbm_to_vmem [thread:$0]  %s56_s0, 128, %s58_s8, [#allocation12]  }
   0xe   :  { %599 = dma.done.wait [#allocation6], 512  }
   0xf   :  { %600 = vsyncadd [#allocation6], 4294966784 }
  0x10   :  { %601 = dma.done.wait [#allocation9], 640  }
  0x11   :  { %602 = vsyncadd [#allocation9], 4294966656 }
  0x12   :  { %603 = dma.done.wait [#allocation12], 128  }
  0x13   :  { %604 = vsyncadd [#allocation12], 4294967168  ;;  %v81_v0 = vld [vmem:[#allocation10] sm:$0xff]  ;;  %v82_v1 = vld [vmem:[#allocation10 + $0x8] sm:$0xff]  ;;  %s613_s11 = smov 1.0   ;;  %s431_s24 = sshll.u32 %s719_s4, 4  ;;  %s432_s24 = int_to_ptr.hbm [resolvable:$true] %s431_s24 }
  0x14   :  { %v83_v2 = vld [vmem:[#allocation10 + $0x10] sm:$0xff]  ;;  %v84_v3 = vld [vmem:[#allocation10 + $0x18] sm:$0xff]  ;;  %v444_v4 = vmul.f32 -1.442695, %v81_v0  ;;  %v445_v5 = vmul.f32 -1.442695, %v82_v1 }
  0x15   :  { %v161_v6 = vld [vmem:[#allocation11] sm:$0xff]  ;;  %v446_v7 = vmul.f32 -1.442695, %v83_v2  ;;  %v447_v8 = vmul.f32 -1.442695, %v84_v3  ;;  %s614_s27 = smov [#allocation13]  }
  0x16   :  { %v162_v9 = vunpack.c.0.s8 %v161_v6  ;;  %v163_v10 = vunpack.c.1.s8 %v161_v6  ;;  %471 = vpow2.f32 %v444_v4  ;;  %v164_v11 = vunpack.c.2.s8 %v161_v6 }
  0x17   :  { %v165_v12 = vunpack.c.3.s8 %v161_v6  ;;  %473 = vpow2.f32 %v445_v5 }
  0x18   :  { %v652_v13 = vcvt.s32.f32 %v162_v9  ;;  %v654_v14 = vcvt.s32.f32 %v163_v10  ;;  %475 = vpow2.f32 %v446_v7  ;;  %v656_v15 = vcvt.s32.f32 %v164_v11 }
  0x19   :  { %477 = vpow2.f32 %v447_v8  ;;  %v658_v16 = vcvt.s32.f32 %v165_v12 }
  0x1a   :  { %v182_v17 = vadd.f32 %v654_v14, %v652_v13 }
  0x1c   :  { %v183_v18 = vadd.f32 %v182_v17, %v656_v15  ;;  %v472_v19 = vpop.eup %471 }
  0x1d   :  { %v474_v20 = vpop.eup %473  ;;  %v97_v21 = vadd.f32 1.0, %v472_v19 }
  0x1e   :  { %v184_v22 = vadd.f32 %v183_v18, %v658_v16  ;;  %v476_v23 = vpop.eup %475  ;;  %v98_v24 = vadd.f32 1.0, %v474_v20 }
  0x1f   :  { %v478_v25 = vpop.eup %477  ;;  %v99_v26 = vadd.f32 1.0, %v476_v23  ;;  %479 = vrcp.f32 %v97_v21  ;;  %v110_v28 = vand.u32 2147483647, %v97_v21  ;;  %v112_v29 = vand.u32 2147483648, %v97_v21 }
  0x20   :  { %371 = vadd.xlane.f32.xlu1 %v184_v22  ;;  %v100_v27 = vadd.f32 1.0, %v478_v25  ;;  %481 = vrcp.f32 %v98_v24  ;;  %v127_v31 = vand.u32 2147483648, %v98_v24  ;;  %vm106_vm0 = vweird.f32 %v97_v21 }
  0x21   :  { %483 = vrcp.f32 %v99_v26  ;;  %vm664_vm1 = vcmp.eq.f32.partialorder %v110_v28, 8.507059e+37  ;;  %vm121_vm2 = vweird.f32 %v98_v24  ;;  %v113_v36 = vor.u32 1.1754944e-38, %v112_v29 }
  0x22   :  { %485 = vrcp.f32 %v100_v27  ;;  %v125_v38 = vand.u32 2147483647, %v98_v24  ;;  %vm136_vm3 = vweird.f32 %v99_v26  ;;  %v140_v41 = vand.u32 2147483647, %v99_v26 }
  0x23   :  { %v128_v44 = vor.u32 1.1754944e-38, %v127_v31  ;;  %v142_v45 = vand.u32 2147483648, %v99_v26  ;;  %vm151_vm8 = vweird.f32 %v100_v27  ;;  %v155_v51 = vand.u32 2147483647, %v100_v27 }
  0x24   :  { %v157_v52 = vand.u32 2147483648, %v100_v27  ;;  %vm126_vm11 = vcmp.eq.f32.partialorder %v125_v38, 8.507059e+37  ;;  %vm141_vm13 = vcmp.eq.f32.partialorder %v140_v41, 8.507059e+37 }
  0x25   :  { %v480_v30 = vpop.eup %479  ;;  %v143_v59 = vor.u32 1.1754944e-38, %v142_v45  ;;  %vm156_vm15 = vcmp.eq.f32.partialorder %v155_v51, 8.507059e+37 }
  0x26   :  { %v482_v32 = vpop.eup %481  ;;  %v102_v33 = vmul.f32 %v480_v30, %v97_v21  ;;  %vm107_vm4 = vweird.f32 %v480_v30  ;;  %v158_v1 = vor.u32 1.1754944e-38, %v157_v52 }
  0x27   :  { %v484_v35 = vpop.eup %483  ;;  %v117_v37 = vmul.f32 %v482_v32, %v98_v24  ;;  %vm122_vm5 = vweird.f32 %v482_v32  ;;  %vm669_vm7 = vmor %vm106_vm0, %vm107_vm4 }
  0x28   :  { %v103_v39 = vsub.f32 1.0, %v102_v33  ;;  %v132_v40 = vmul.f32 %v484_v35, %v99_v26  ;;  %v486_v42 = vpop.eup %485  ;;  %vm137_vm6 = vweird.f32 %v484_v35  ;;  %vm674_vm9 = vmor %vm121_vm2, %vm122_vm5 }
  0x29   :  { %v118_v43 = vsub.f32 1.0, %v117_v37  ;;  %v147_v48 = vmul.f32 %v486_v42, %v100_v27  ;;  %vm152_vm10 = vweird.f32 %v486_v42  ;;  %vm679_vm12 = vmor %vm136_vm3, %vm137_vm6 }
  0x2a   :  { %v104_v46 = vmul.f32 %v480_v30, %v103_v39  ;;  %v133_v47 = vsub.f32 1.0, %v132_v40  ;;  %vm153_vm14 = vmor %vm151_vm8, %vm152_vm10 }
  0x2b   :  { %v119_v50 = vmul.f32 %v482_v32, %v118_v43  ;;  %v148_v56 = vsub.f32 1.0, %v147_v48 }
  0x2c   :  { %v105_v53 = vadd.f32 %v480_v30, %v104_v46  ;;  %v134_v55 = vmul.f32 %v484_v35, %v133_v47 }
  0x2d   :  { %v120_v57 = vadd.f32 %v482_v32, %v119_v50  ;;  %v149_v62 = vmul.f32 %v486_v42, %v148_v56 }
  0x2e   :  { %v109_v60 = vsel %vm669_vm7, %v480_v30, %v105_v53  ;;  %v135_v61 = vadd.f32 %v484_v35, %v134_v55 }
  0x2f   :  { %v114_v63 = vsel %vm664_vm1, %v113_v36, %v109_v60  ;;  %v124_v0 = vsel %vm674_vm9, %v482_v32, %v120_v57  ;;  %v150_v4 = vadd.f32 %v486_v42, %v149_v62 }
  0x30   :  { %v129_v2 = vsel %vm126_vm11, %v128_v44, %v124_v0  ;;  %v139_v3 = vsel %vm679_vm12, %v484_v35, %v135_v61  ;;  %v174_v5 = vmul.f32 %v652_v13, %v114_v63 }
  0x31   :  { %v144_v6 = vsel %vm141_vm13, %v143_v59, %v139_v3  ;;  %v170_v7 = vadd.f32 %v129_v2, %v114_v63  ;;  %v175_v8 = vmul.f32 %v654_v14, %v129_v2  ;;  %v154_v9 = vsel %vm153_vm14, %v486_v42, %v150_v4 }
  0x32   :  { %v159_v10 = vsel %vm156_vm15, %v158_v1, %v154_v9  ;;  %v176_v12 = vmul.f32 %v656_v15, %v144_v6 }
  0x33   :  { %v171_v11 = vadd.f32 %v170_v7, %v144_v6  ;;  %v178_v17 = vadd.f32 %v175_v8, %v174_v5  ;;  %v177_v19 = vmul.f32 %v658_v16, %v159_v10 }
  0x35   :  { %v172_v18 = vadd.f32 %v171_v11, %v159_v10  ;;  %v179_v20 = vadd.f32 %v178_v17, %v176_v12 }
  0x37   :  { %350 = vadd.xlane.f32.xlu0 %v172_v18  ;;  %v180_v21 = vadd.f32 %v179_v20, %v177_v19 }
  0x3f   :  { %361 = vadd.xlane.f32.xlu0 %v180_v21 }
  0x93   :  { %v372_v22 = vpop.xlane.xlu1 %371 }
  0x94   :  { %v373_v13 = vrot.slane %v372_v22, 4 }
  0x96   :  { %v374_v26 = vadd.f32 %v373_v13, %v372_v22 }
  0x98   :  { %v375_v28 = vrot.slane %v374_v26, 2 }
  0x9a   :  { %v376_v33 = vadd.f32 %v375_v28, %v374_v26 }
  0x9c   :  { %v377_v35 = vrot.slane %v376_v33, 1 }
  0x9e   :  { %v378_v38 = vadd.f32 %v377_v35, %v376_v33 }
  0xaa   :  { %v351_v23 = vpop.xlane.xlu0 %350 }
  0xab   :  { %v352_v24 = vrot.slane %v351_v23, 4 }
  0xad   :  { %v353_v25 = vadd.f32 %v352_v24, %v351_v23 }
  0xaf   :  { %v354_v14 = vrot.slane %v353_v25, 2 }
  0xb1   :  { %v355_v27 = vadd.f32 %v354_v14, %v353_v25 }
  0xb2   :  { %v362_v29 = vpop.xlane.xlu0 %361 }
  0xb3   :  { %v363_v30 = vrot.slane %v362_v29, 4  ;;  %v356_v15 = vrot.slane %v355_v27, 1 }
  0xb5   :  { %v364_v31 = vadd.f32 %v363_v30, %v362_v29  ;;  %v357_v32 = vadd.f32 %v356_v15, %v355_v27 }
  0xb7   :  { %v365_v16 = vrot.slane %v364_v31, 2  ;;  %453 = vpush %v357_v32 }
  0xb9   :  { %v366_v34 = vadd.f32 %v365_v16, %v364_v31 }
  0xbb   :  { %v367_v36 = vrot.slane %v366_v34, 1 }
  0xbd   :  { %v368_v37 = vadd.f32 %v367_v36, %v366_v34 }
  0xbf   :  { %455 = vpush %v368_v37 }
  0xc0   :  { %457 = vpush %v378_v38 }
  0xe8   :  { %s696_s2 = spop %453 }
  0xe9   :  { %s452_s14 = sadd.f32 -1548.0, %s696_s2 }
  0xf0   :  { %s698_s3 = spop %455 }
  0xf1   :  { %s700_s9 = spop %457  ;;  %s380_s16 = ssub.f32 %s452_s14, %s698_s3 }
  0xf2   :  { %s381_s10 = ssub.f32 1000.0, %s700_s9  ;;  %s382_s12 = smax.f32 %s613_s11, %s700_s9 }
  0xf3   :  { %v383_v39 = vstv %s382_s12  ;;  %p418_p0 = scmp.eq.f32.partialorder %s700_s9, 0.0 }
  0xf4   :  { %487 = vrcp.f32 %v383_v39  ;;  %s400_s13 = smax.f32 %s613_s11, %s381_s10  ;;  %v395_v46 = vand.u32 2147483648, %v383_v39  ;;  %v393_v48 = vand.u32 2147483647, %v383_v39  ;;  %vm389_vm1 = vweird.f32 %v383_v39  ;;  %p420_p1 = scmp.eq.f32.partialorder %s381_s10, 0.0 }
  0xf5   :  { %v401_v40 = vstv %s400_s13 }
  0xf6   :  { %489 = vrcp.f32 %v401_v40  ;;  %v413_v50 = vand.u32 2147483648, %v401_v40  ;;  %v411_v53 = vand.u32 2147483647, %v401_v40  ;;  %v396_v54 = vor.u32 1.1754944e-38, %v395_v46 }
  0xf7   :  { %vm394_vm4 = vcmp.eq.f32.partialorder %v393_v48, 8.507059e+37  ;;  %vm407_vm5 = vweird.f32 %v401_v40 }
  0xf8   :  { %v414_v58 = vor.u32 1.1754944e-38, %v413_v50  ;;  %vm412_vm7 = vcmp.eq.f32.partialorder %v411_v53, 8.507059e+37 }
  0xfa   :  { %v488_v41 = vpop.eup %487 }
  0xfb   :  { %v385_v42 = vmul.f32 %v488_v41, %v383_v39  ;;  %vm390_vm0 = vweird.f32 %v488_v41 }
  0xfc   :  { %v490_v43 = vpop.eup %489  ;;  %vm391_vm3 = vmor %vm389_vm1, %vm390_vm0 }
  0xfd   :  { %v386_v44 = vsub.f32 1.0, %v385_v42  ;;  %v403_v45 = vmul.f32 %v490_v43, %v401_v40  ;;  %vm408_vm2 = vweird.f32 %v490_v43 }
  0xfe   :  { %vm409_vm6 = vmor %vm407_vm5, %vm408_vm2 }
  0xff   :  { %v387_v47 = vmul.f32 %v488_v41, %v386_v44  ;;  %v404_v49 = vsub.f32 1.0, %v403_v45 }
 0x101   :  { %v388_v51 = vadd.f32 %v488_v41, %v387_v47  ;;  %v405_v52 = vmul.f32 %v490_v43, %v404_v49 }
 0x103   :  { %v392_v55 = vsel %vm391_vm3, %v488_v41, %v388_v51  ;;  %v406_v56 = vadd.f32 %v490_v43, %v405_v52 }
 0x104   :  { %v397_v57 = vsel %vm394_vm4, %v396_v54, %v392_v55 }
 0x105   :  { %459 = vpush %v397_v57  ;;  %v410_v59 = vsel %vm409_vm6, %v490_v43, %v406_v56 }
 0x106   :  { %v415_v60 = vsel %vm412_vm7, %v414_v58, %v410_v59 }
 0x107   :  { %461 = vpush %v415_v60 }
 0x136   :  { %s460_s15 = spop %459 }
 0x137   :  { %s399_s17 = smul.f32 %s460_s15, %s698_s3 }
 0x138   :  { %s462_s18 = spop %461 }
 0x139   :  { %s417_s19 = smul.f32 %s462_s18, %s380_s16 }
 0x13b   :  { %s419_s20 = scalar_select %p418_p0, %s417_s19, %s399_s17 }
 0x13d   :  { %s421_s21 = scalar_select %p420_p1, %s419_s20, %s417_s19 }
 0x13f   :  { %s422_s25 = ssub.f32 %s419_s20, %s421_s21 }
 0x141   :  { %s423_s26 = smul.f32 %s422_s25, %s422_s25 }
 0x143   :  { %425 = sst [smem:[#allocation13]] %s423_s26 }
 0x144   :  { %434 = dma.smem_to_hbm %s614_s27, 16, %s432_s24, [#allocation7]  }
 0x145   :  { %605 = dma.done.wait [#allocation7], 16  }
 0x146   :  { %606 = vsyncadd [#allocation7], 4294967280 }
 0x147   :  { %439 = sfence }
 0x148   :  { %440 = vsyncpa [#allocation6], 1 }
 0x149   :  { %441 = vsyncpa [#allocation9], 1 }
 0x14a   :  { %442 = vsyncpa [#allocation12], 1 }
 0x14b   :  { %443 = vsyncpa [#allocation7], 1 }

</bundles_post_ra>
